<compile_context>
chip_gen: v6e
topology: v6e:2x2x1
jax: 0.10.0
libtpu: 0.0.40
codegen_flags: <defaults>
</compile_context>

<pallas_src>
import functools

import jax
import jax.numpy as jnp
from jax import lax
from jax.experimental import pallas as pl
from jax.experimental.pallas import tpu as pltpu


# ---------------------------------------------------------------------------
# Kernels
# ---------------------------------------------------------------------------

def _fused_linear_bn_kernel(x_ref, w_ref, g_ref, beta_ref, o_ref, *, eps):
    """Single-step path. Grid: (branch,). Refs: x (B,K), w (K,N), out (B,N)."""
    y = jnp.dot(x_ref[...], w_ref[...], preferred_element_type=jnp.float32)
    mean = jnp.mean(y, axis=0, keepdims=True)           # batch mean
    yc = y - mean
    var = jnp.mean(yc * yc, axis=0, keepdims=True)      # biased variance
    inv = lax.rsqrt(var + eps)
    o_ref[...] = (yc * inv * g_ref[...] + beta_ref[...]).astype(o_ref.dtype)
    # TODO(synk): training-mode Dropout(p=0.5) omitted; inference forward is
    #             the identity (running-stat updates are a side effect, not
    #             part of the returned tensors).


def _tiled_linear_bn_kernel(x_ref, w_ref, g_ref, beta_ref, o_ref, *, eps):
    """Tiled fallback. Grid: (branch, N//tn, K//tk); K is the reduction axis.

    The f32 output tile (B, tn) is resident across the K axis (its index_map
    ignores k), so we accumulate directly into o_ref — no scratch accumulator.
    """
    k = pl.program_id(2)

    @pl.when(k == 0)
    def _():
        o_ref[...] = jnp.zeros_like(o_ref)

    o_ref[...] += jnp.dot(x_ref[...], w_ref[...],
                          preferred_element_type=jnp.float32)

    @pl.when(k == pl.num_programs(2) - 1)
    def _():
        y = o_ref[...]
        mean = jnp.mean(y, axis=0, keepdims=True)
        yc = y - mean
        var = jnp.mean(yc * yc, axis=0, keepdims=True)
        inv = lax.rsqrt(var + eps)
        o_ref[...] = yc * inv * g_ref[...] + beta_ref[...]


# ---------------------------------------------------------------------------
# Wrapper
# ---------------------------------------------------------------------------

# Conservative VMEM budget that is safe on v5e/v6e (128 MiB) and within the
# 32 MiB default scoped limit on v7x (64 MiB physical) without needing
# vmem_limit_bytes overrides.
_VMEM_BUDGET_BYTES = 24 << 20


def _fits_vmem(B, K, N, itemsize):
    # Double-buffered x and w tiles + double-buffered f32 output + gamma/beta.
    need = 2 * (B * K + K * N) * itemsize + 2 * B * N * 4 + 2 * 2 * N * 4
    return need <= _VMEM_BUDGET_BYTES


def _pick_tile(d):
    # Largest lane-aligned tile dividing d; full extent is always legal.
    for t in (512, 256, 128):
        if d % t == 0:
            return t
    return d


def shared_zoom_forward(params, text_features, image_features, *, eps=1e-5,
                        force_tiles=None):
    """Pallas implementation of shared_zoom.forward(text, image) -> (t, v).

    Both branches run in ONE pallas_call (branch grid axis, "parallel").
    The Linear bias is dropped: training-mode BN's batch-mean subtraction
    cancels it exactly, so it cannot affect the returned tensors.
    """
    B, K = text_features.shape
    assert image_features.shape == (B, K)
    N, K_w = params["w_t"].shape
    assert K_w == K and params["w_v"].shape == (N, K)

    # Stack the two branches; transpose weights ONCE (wrapper-side, amortized)
    # to [K, N] so the kernel runs a standard NN contraction — no in-kernel
    # transpose. Keep native dtype (bf16 inputs halve weight HBM traffic).
    x_stack = jnp.stack([text_features, image_features], axis=0)           # [2,B,K]
    w_stack = jnp.stack([params["w_t"].T, params["w_v"].T], axis=0)        # [2,K,N]
    g2 = params["gamma"].reshape(1, N).astype(jnp.float32)
    be2 = params["beta"].reshape(1, N).astype(jnp.float32)

    use_collapsed = force_tiles is None and _fits_vmem(B, K, N,
                                                       x_stack.dtype.itemsize)

    if use_collapsed:
        out = pl.pallas_call(
            functools.partial(_fused_linear_bn_kernel, eps=eps),
            out_shape=jax.ShapeDtypeStruct((2, B, N), jnp.float32),
            grid_spec=pltpu.PrefetchScalarGridSpec(
                num_scalar_prefetch=0,
                grid=(2,),  # branch axis only — single compute step per branch
                in_specs=[
                    pl.BlockSpec((pl.Squeezed(), B, K), lambda b: (b, 0, 0)),
                    pl.BlockSpec((pl.Squeezed(), K, N), lambda b: (b, 0, 0)),
                    pl.BlockSpec((1, N), lambda b: (0, 0)),   # shared gamma
                    pl.BlockSpec((1, N), lambda b: (0, 0)),   # shared beta
                ],
                out_specs=pl.BlockSpec((pl.Squeezed(), B, N),
                                       lambda b: (b, 0, 0)),
            ),
            compiler_params=pltpu.CompilerParams(
                dimension_semantics=("parallel",),  # 2-way TC split on v7x
            ),
        )(x_stack, w_stack, g2, be2)
    else:
        tk, tn = force_tiles if force_tiles else (_pick_tile(K), _pick_tile(N))
        assert K % tk == 0 and N % tn == 0
        out = pl.pallas_call(
            functools.partial(_tiled_linear_bn_kernel, eps=eps),
            out_shape=jax.ShapeDtypeStruct((2, B, N), jnp.float32),
            grid_spec=pltpu.PrefetchScalarGridSpec(
                num_scalar_prefetch=0,
                grid=(2, N // tn, K // tk),
                in_specs=[
                    pl.BlockSpec((pl.Squeezed(), B, tk),
                                 lambda b, n, k: (b, 0, k)),
                    pl.BlockSpec((pl.Squeezed(), tk, tn),
                                 lambda b, n, k: (b, k, n)),
                    pl.BlockSpec((1, tn), lambda b, n, k: (0, n)),
                    pl.BlockSpec((1, tn), lambda b, n, k: (0, n)),
                ],
                out_specs=pl.BlockSpec((pl.Squeezed(), B, tn),
                                       lambda b, n, k: (b, 0, n)),
            ),
            compiler_params=pltpu.CompilerParams(
                dimension_semantics=("parallel", "parallel", "arbitrary"),
            ),
        )(x_stack, w_stack, g2, be2)

    return out[0], out[1]


# ---------------------------------------------------------------------------
# Pure-JAX reference (mirrors the PyTorch forward, BN training-mode stats)
# ---------------------------------------------------------------------------

def shared_zoom_ref(params, text_features, image_features, eps=1e-5):
    def branch(x, w, b):
        y = jnp.dot(x.astype(jnp.float32), w.T.astype(jnp.float32),
                    precision=jax.lax.Precision.HIGHEST) + b.astype(jnp.float32)
        mean = jnp.mean(y, axis=0, keepdims=True)
        var = jnp.mean((y - mean) ** 2, axis=0, keepdims=True)
        return (y - mean) / jnp.sqrt(var + eps) * params["gamma"] + params["beta"]
    return (branch(text_features, params["w_t"], params["b_t"]),
            branch(image_features, params["w_v"], params["b_v"]))


if __name__ == "__main__":
    key = jax.random.PRNGKey(0)
    ks = jax.random.split(key, 8)

    B, H = 8, 384  # small: batch=8, hidden_size=384 (lane-aligned)
    text = jax.random.normal(ks[0], (B, H), dtype=jnp.float32)
    image = jax.random.normal(ks[1], (B, H), dtype=jnp.float32)

    scale = 1.0 / jnp.sqrt(jnp.float32(H))
    params = {
        "w_t": jax.random.uniform(ks[2], (H, H), jnp.float32, -scale, scale),
        "b_t": jax.random.uniform(ks[3], (H,), jnp.float32, -scale, scale),
        "w_v": jax.random.uniform(ks[4], (H, H), jnp.float32, -scale, scale),
        "b_v": jax.random.uniform(ks[5], (H,), jnp.float32, -scale, scale),
        "gamma": jnp.ones((H,), jnp.float32)
                 + 0.1 * jax.random.normal(ks[6], (H,), jnp.float32),
        "beta": 0.1 * jax.random.normal(ks[7], (H,), jnp.float32),
    }

    ref_t, ref_v = jax.block_until_ready(shared_zoom_ref(params, text, image))

    # 1) Default collapsed path: one pallas_call, grid=(2,), full-extent blocks.
    out_t, out_v = jax.block_until_ready(shared_zoom_forward(params, text, image))
    err_t = float(jnp.max(jnp.abs(out_t - ref_t)))
    err_v = float(jnp.max(jnp.abs(out_v - ref_v)))
    assert jnp.allclose(out_t, ref_t, rtol=2e-4, atol=2e-4), err_t
    assert jnp.allclose(out_v, ref_v, rtol=2e-4, atol=2e-4), err_v

    # 2) Tiled fallback path (used for large H), exercised here with 128 tiles.
    til_t, til_v = jax.block_until_ready(
        shared_zoom_forward(params, text, image, force_tiles=(128, 128)))
    err_tt = float(jnp.max(jnp.abs(til_t - ref_t)))
    err_tv = float(jnp.max(jnp.abs(til_v - ref_v)))
    assert jnp.allclose(til_t, ref_t, rtol=2e-4, atol=2e-4), err_tt
    assert jnp.allclose(til_v, ref_v, rtol=2e-4, atol=2e-4), err_tv

    print("KERNEL_OK")
</pallas_src>

<mosaic_0001>
module attributes {stable_mosaic.version = 11 : i64} {
  func.func @_fused_linear_bn_kernel(%arg0: i32, %arg1: memref<1x8x384xf32, #tpu.memory_space<vmem>>, %arg2: memref<1x384x384xf32, #tpu.memory_space<vmem>>, %arg3: memref<1x384xf32, #tpu.memory_space<vmem>>, %arg4: memref<1x384xf32, #tpu.memory_space<vmem>>, %arg5: memref<1x8x384xf32, #tpu.memory_space<vmem>>) attributes {dimension_semantics = [#tpu.dimension_semantics<parallel>], iteration_bounds = array<i64: 2>, scalar_prefetch = 0 : i64, scratch_operands = 0 : i64, tpu.core_type = #tpu.core_type<tc>, window_params = [{transform_indices = @transform_0, window_bounds = array<i64: 1, 8, 384>}, {transform_indices = @transform_1, window_bounds = array<i64: 1, 384, 384>}, {pipeline_mode = #tpu.pipeline_mode<synchronous>, transform_indices = @transform_2, window_bounds = array<i64: 1, 384>}, {pipeline_mode = #tpu.pipeline_mode<synchronous>, transform_indices = @transform_3, window_bounds = array<i64: 1, 384>}, {transform_indices = @transform_4, window_bounds = array<i64: 1, 8, 384>}]} {
    %c0 = arith.constant 0 : index
    %c0_0 = arith.constant 0 : index
    %c0_1 = arith.constant 0 : index
    %0 = vector.load %arg1[%c0, %c0_0, %c0_1] : memref<1x8x384xf32, #tpu.memory_space<vmem>>, vector<1x8x384xf32>
    %1 = vector.shape_cast %0 : vector<1x8x384xf32> to vector<8x384xf32>
    %c0_2 = arith.constant 0 : index
    %c0_3 = arith.constant 0 : index
    %c0_4 = arith.constant 0 : index
    %2 = vector.load %arg2[%c0_2, %c0_3, %c0_4] : memref<1x384x384xf32, #tpu.memory_space<vmem>>, vector<1x384x384xf32>
    %3 = vector.shape_cast %2 : vector<1x384x384xf32> to vector<384x384xf32>
    %cst = arith.constant dense<0.000000e+00> : vector<8x384xf32>
    %4 = tpu.matmul %1, %3, %cst {dimension_numbers = #tpu.dot_dimension_numbers<[1], [0], [0], [1], [0, 0, 1, 1], [], []>} : vector<8x384xf32>, vector<384x384xf32>, vector<8x384xf32> -> vector<8x384xf32>
    %cst_5 = arith.constant dense<0.000000e+00> : vector<384xf32>
    %5 = vector.multi_reduction <add>, %4, %cst_5 [0] : vector<8x384xf32> to vector<384xf32>
    %6 = vector.shape_cast %5 : vector<384xf32> to vector<1x384xf32>
    %cst_6 = arith.constant 8.000000e+00 : f32
    %7 = vector.broadcast %cst_6 : f32 to vector<1x384xf32>
    %8 = arith.divf %6, %7 : vector<1x384xf32>
    %9 = vector.broadcast %8 : vector<1x384xf32> to vector<8x384xf32>
    %10 = arith.subf %4, %9 : vector<8x384xf32>
    %11 = arith.mulf %10, %10 : vector<8x384xf32>
    %cst_7 = arith.constant dense<0.000000e+00> : vector<384xf32>
    %12 = vector.multi_reduction <add>, %11, %cst_7 [0] : vector<8x384xf32> to vector<384xf32>
    %13 = vector.shape_cast %12 : vector<384xf32> to vector<1x384xf32>
    %cst_8 = arith.constant 8.000000e+00 : f32
    %14 = vector.broadcast %cst_8 : f32 to vector<1x384xf32>
    %15 = arith.divf %13, %14 : vector<1x384xf32>
    %cst_9 = arith.constant 9.99999974E-6 : f32
    %16 = vector.broadcast %cst_9 : f32 to vector<1x384xf32>
    %17 = arith.addf %15, %16 : vector<1x384xf32>
    %18 = math.rsqrt %17 : vector<1x384xf32>
    %19 = vector.broadcast %18 : vector<1x384xf32> to vector<8x384xf32>
    %20 = arith.mulf %10, %19 : vector<8x384xf32>
    %c0_10 = arith.constant 0 : index
    %c0_11 = arith.constant 0 : index
    %21 = vector.load %arg3[%c0_10, %c0_11] : memref<1x384xf32, #tpu.memory_space<vmem>>, vector<1x384xf32>
    %22 = vector.broadcast %21 : vector<1x384xf32> to vector<8x384xf32>
    %23 = arith.mulf %20, %22 : vector<8x384xf32>
    %c0_12 = arith.constant 0 : index
    %c0_13 = arith.constant 0 : index
    %24 = vector.load %arg4[%c0_12, %c0_13] : memref<1x384xf32, #tpu.memory_space<vmem>>, vector<1x384xf32>
    %25 = vector.broadcast %24 : vector<1x384xf32> to vector<8x384xf32>
    %26 = arith.addf %23, %25 : vector<8x384xf32>
    %c0_14 = arith.constant 0 : index
    %c0_15 = arith.constant 0 : index
    %c0_16 = arith.constant 0 : index
    %27 = vector.load %arg5[%c0_14, %c0_15, %c0_16] : memref<1x8x384xf32, #tpu.memory_space<vmem>>, vector<1x8x384xf32>
    %28 = vector.shape_cast %27 : vector<1x8x384xf32> to vector<8x384xf32>
    %29 = vector.shape_cast %26 : vector<8x384xf32> to vector<1x8x384xf32>
    tpu.vector_store %arg5[%c0_14, %c0_15, %c0_16], %29 {strides = array<i32>} : memref<1x8x384xf32, #tpu.memory_space<vmem>>, vector<1x8x384xf32>,
    return
  }
  func.func @transform_0(%arg0: i32) -> (i32, i32, i32) {
    %c0_i32 = arith.constant 0 : i32
    %c0_i32_0 = arith.constant 0 : i32
    %c0_i32_1 = arith.constant 0 : i32
    return %arg0, %c0_i32, %c0_i32_0 : i32, i32, i32
  }
  func.func @transform_1(%arg0: i32) -> (i32, i32, i32) {
    %c0_i32 = arith.constant 0 : i32
    %c0_i32_0 = arith.constant 0 : i32
    %c0_i32_1 = arith.constant 0 : i32
    return %arg0, %c0_i32, %c0_i32_0 : i32, i32, i32
  }
  func.func @transform_2(%arg0: i32) -> (i32, i32) {
    %c0_i32 = arith.constant 0 : i32
    %c0_i32_0 = arith.constant 0 : i32
    %c0_i32_1 = arith.constant 0 : i32
    return %c0_i32, %c0_i32_0 : i32, i32
  }
  func.func @transform_3(%arg0: i32) -> (i32, i32) {
    %c0_i32 = arith.constant 0 : i32
    %c0_i32_0 = arith.constant 0 : i32
    %c0_i32_1 = arith.constant 0 : i32
    return %c0_i32, %c0_i32_0 : i32, i32
  }
  func.func @transform_4(%arg0: i32) -> (i32, i32, i32) {
    %c0_i32 = arith.constant 0 : i32
    %c0_i32_0 = arith.constant 0 : i32
    %c0_i32_1 = arith.constant 0 : i32
    return %arg0, %c0_i32, %c0_i32_0 : i32, i32, i32
  }
}

</mosaic_0001>

<bundles_post_ra>
// kernel: tpu_custom_call.1
= control target key start
LH: loop header
LB: loop body
LE: loop exit
PB: predicated region body
PF: predicated region fallthrough
CT: control target
= control target key end

     0   :  { %9 = vsyncpa [#allocation3], 0  ;;  %s1748_s0 = inlined_call_operand.hbm [shape: f32[2,8,384], index: 0, kind: input, shape index: {}]   ;;  %s1749_s1 = inlined_call_operand.hbm [shape: f32[2,384,384], index: 1, kind: input, shape index: {}]   ;;  %s1750_s2 = inlined_call_operand.hbm [shape: f32[1,384], index: 2, kind: input, shape index: {}]   ;;  %s1751_s3 = inlined_call_operand.hbm [shape: f32[1,384], index: 3, kind: input, shape index: {}]   ;;  %s1752_s4 = inlined_call_operand.hbm [shape: f32[2,8,384], index: 4, kind: output, shape index: {}]  }
   0x1   :  { %11 = vsyncpa [#allocation3 + $0x1], 0 }
   0x2   :  { %12 = vsyncpa [#allocation6], 0 }
   0x3   :  { %14 = vsyncpa [#allocation6 + $0x1], 0 }
   0x4   :  { %15 = vsyncpa [#allocation9], 0 }
   0x5   :  { %16 = vsyncpa [#allocation4], 0 }
   0x6   :  { %18 = vsyncpa [#allocation4 + $0x1], 0  ;;  %s1345_s15 = smov 0   ;;  %s1347_s16 = smov 0  }
   0x7   :  { %s1349_s17 = smov 0   ;;  %s1351_s18 = smov 0  }
   0x8 LB: > { %s1366_s19 = sadd.s32 4294967295, %s1309_s18   ;;  %s936_s20 = sadd.s32 4294967294, %s1309_s18   ;;  %s1309_s18 = sphi %s1351_s18, %s1776_s18   ;;  %s1305_s17 = sphi %s1349_s17, %s1775_s17   ;;  %s1301_s16 = sphi %s1347_s16, %s1774_s16   ;;  %s1297_s15 = sphi %s1345_s15, %s1773_s15  }
   0x9   : > { %p44_p0 = scmp.ne.s32.totalorder %s1301_s16, %s1297_s15  ;;  %p1753_p1 = scmp.eq.s32.totalorder %s1366_s19, 0 }
   0xa   : > { %p142_p3 = scmp.eq.s32.totalorder %s936_s20, 1  ;;  %p937_p5 = scmp.ge.s32.totalorder %s1309_s18, 1 }
   0xb   : > { %p1375_p4 = por %p1753_p1, %p44_p0  ;;  %p149_p7 = scmp.lt.s32.totalorder %s1309_s18, 3 }
   0xc   : > { %p1380_p6 = por %p142_p3, %p44_p0  ;;  %s1311_s24 = smov [#allocation7]  }
   0xd   : > { %s1757_s21 = scalar_select %p1375_p4, 1, 0 }
   0xe   : > { %s1758_s22 = scalar_select %p1380_p6, 1, 0 }
   0xf   : > { %p1385_p8 = pnand %p937_p5, %p149_p7  ;;  %s162_s25 = sshll.u32 %s1311_s24, 4  ;;  %s163_s25 = int_to_ptr.vmem [resolvable:$true] %s162_s25 }
  0x10   : > { %s1312_s26 = smov [#allocation8]   ;;  %s1399_s29 = sadd.s32 1, %s1309_s18  }
  0x11   : > { %s1759_s23 = scalar_select %p1385_p8, 1, 0 }
  0x12   : > { %p1057_p10 = pneg %p1385_p8  ;;  %s173_s27 = sshll.u32 %s1312_s26, 4  ;;  %s174_s27 = int_to_ptr.vmem [resolvable:$true] %s173_s27 }
  0x13   : > { %s28_s30 = ssub.s32 %s1309_s18, %s1399_s29  ;;  %s1136_s5 = scalar_lea.vmem %s163_s25, 48 }
  0x14   : > { %p1394_p11 = pnand %p1057_p10, %p1753_p1  ;;  %p1137_p13 = scmp.ne.s32.totalorder %s163_s25, %s1136_s5 }
  0x15   : > { %s1143_s6 = scalar_lea.vmem %s163_s25, 64  ;;  %p1144_p5 = scmp.lt.s32.totalorder %s163_s25, %s163_s25 }
  0x16   : > { %p1127_p12 = pneg %p1394_p11  ;;  %p1145_p7 = scmp.lt.s32.totalorder %s1143_s6, %s1136_s5 }
  0x18   : > { %p1139_p0 = pnand %p1137_p13, %p1127_p12  ;;  %p1146_p10 = por %p1145_p7, %p1144_p5 }
  0x1a   : > { %p1140_p3 = pneg %p1139_p0 }
  0x1c   : > { %p1147_p9 = pnand %p1146_p10, %p1140_p3 }
  0x1e   : > { %1150 = shalt.err (!%p1147_p9)
}
  0x1f   : > { %1060 = dma.hbm_to_vmem [thread:$0]  (!%p1394_p11), %s1750_s2, 48, %s163_s25, [#allocation6]  }
  0x20   : > { %s1162_s9 = scalar_lea.vmem %s174_s27, 48  ;;  %s1169_s10 = scalar_lea.vmem %s174_s27, 64 }
  0x21   : > { %p1163_p1 = scmp.ne.s32.totalorder %s174_s27, %s1162_s9  ;;  %p1170_p0 = scmp.lt.s32.totalorder %s174_s27, %s174_s27 }
  0x22   : > { %p1171_p6 = scmp.lt.s32.totalorder %s1169_s10, %s1162_s9 }
  0x23   : > { %p1165_p2 = pnand %p1163_p1, %p1127_p12 }
  0x24   : > { %p1172_p4 = por %p1171_p6, %p1170_p0 }
  0x25   : > { %p1166_p13 = pneg %p1165_p2 }
  0x27   : > { %p1173_p5 = pnand %p1172_p4, %p1166_p13 }
  0x29   : > { %1176 = shalt.err (!%p1173_p5)
}
  0x2a   : > { %1063 = dma.hbm_to_vmem [thread:$0]  (!%p1394_p11), %s1751_s3, 48, %s174_s27, [#allocation9]  }
  0x2b   : > { %p29_p1 = scmp.eq.s32.totalorder %s28_s30, 0  ;;  %s31_s13 = sadd.s32 1, %s1305_s17 }
  0x2c   : > { %p38_p2 = scmp.ne.s32.totalorder %s1305_s17, %s1301_s16  ;;  %p39_p4 = scmp.eq.s32.totalorder %s1309_s18, 0 }
  0x2d   : > { %s1426_s14 = scalar_select %p29_p1, %s1305_s17, %s31_s13  }
  0x2e   : > { %p40_p6 = por %p39_p4, %p38_p2  ;;  %p1761_p9 = scmp.eq.s32.totalorder %s1366_s19, 1 }
  0x2f   : > { %p1077_p3 = scmp.lt.s32.totalorder %s1309_s18, 2  ;;  %s1436_s24 = sand.u32 1, %s1305_s17  }
  0x30   : > { %p1430_p12 = por %p1761_p9, %p38_p2  ;;  %s1036_s25 = smul.u32 24, %s1436_s24 }
  0x31   : > { %s1037_s26 = smul.u32 384, %s1309_s18  ;;  %p1440_p11 = pnand %p1077_p3, %p40_p6 }
  0x32   : > { %s1762_s20 = scalar_select %p1430_p12, 1, 0 }
  0x33   : > { %s1038_s28 = smul.u32 1152, %s1436_s24  ;;  %s1448_s6 = scalar_lea.hbm %s1748_s0, %s1037_s26 }
  0x34   : > { %s188_s7 = scalar_lea.vmem [#allocation2], %s1036_s25  ;;  %s185_s9 = scalar_lea.sflag [#allocation3], %s1436_s24 }
  0x35   : > { %s196_s8 = sshll.u32 %s188_s7, 4  ;;  %s1177_s10 = scalar_lea.hbm %s1448_s6, 384  ;;  %s197_s8 = int_to_ptr.vmem [resolvable:$true] %s196_s8 }
  0x36   : > { %p1178_p7 = scmp.ne.s32.totalorder %s1448_s6, %s1177_s10  ;;  %p1179_p10 = pneg %p1440_p11 }
  0x37   : > { %s1182_s13 = scalar_lea.hbm %s1748_s0, 768  ;;  %p1183_p5 = scmp.lt.s32.totalorder %s1448_s6, %s1748_s0 }
  0x38   : > { %p1180_p13 = pnand %p1179_p10, %p1178_p7  ;;  %p1184_p1 = scmp.lt.s32.totalorder %s1182_s13, %s1177_s10 }
  0x3a   : > { %p1181_p0 = pneg %p1180_p13  ;;  %p1185_p2 = por %p1184_p1, %p1183_p5 }
  0x3c   : > { %p1186_p4 = pnand %p1185_p2, %p1181_p0 }
  0x3e   : > { %1189 = shalt.err (!%p1186_p4)
}
  0x3f   : > { %s1190_s25 = scalar_lea.vmem %s197_s8, 384  ;;  %s1313_s5 = smov [#allocation2]  }
  0x40   : > { %p1191_p6 = scmp.ne.s32.totalorder %s197_s8, %s1190_s25  ;;  %s1195_s7 = sshll.u32 %s1313_s5, 4  ;;  %s1196_s7 = int_to_ptr.vmem [resolvable:$false] %s1195_s7 }
  0x41   : > { %s1197_s11 = scalar_lea.vmem %s1196_s7, 768  ;;  %p1198_p7 = scmp.lt.s32.totalorder %s197_s8, %s1196_s7 }
  0x42   : > { %p1193_p9 = pnand %p1191_p6, %p1179_p10  ;;  %p1199_p13 = scmp.lt.s32.totalorder %s1197_s11, %s1190_s25 }
  0x44   : > { %p1194_p3 = pneg %p1193_p9  ;;  %p1200_p12 = por %p1199_p13, %p1198_p7 }
  0x46   : > { %p1201_p8 = pnand %p1200_p12, %p1194_p3 }
  0x48   : > { %1204 = shalt.err (!%p1201_p8)
}
  0x49   : > { %1067 = dma.hbm_to_vmem [thread:$0]  (!%p1440_p11), %s1448_s6, 384, %s197_s8, %s185_s9  }
  0x4a   : > { %s203_s10 = sand.u32 1, %s1309_s18   ;;  %s207_s12 = scalar_lea.vmem [#allocation5], %s1038_s28 }
  0x4b   : > { %s214_s13 = sshll.u32 %s207_s12, 4  ;;  %s1039_s26 = smul.u32 18432, %s1309_s18  ;;  %s1474_s13 = int_to_ptr.vmem [resolvable:$true] %s214_s13 }
  0x4c   : > { %s1482_s7 = scalar_lea.sflag [#allocation6], %s203_s10  ;;  %s1210_s6 = scalar_lea.hbm %s1749_s1, 36864 }
  0x4d   : > { %s1480_s5 = scalar_lea.hbm %s1749_s1, %s1039_s26 }
  0x4e   : > { %s1205_s11 = scalar_lea.hbm %s1480_s5, 18432  ;;  %p1211_p5 = scmp.lt.s32.totalorder %s1480_s5, %s1749_s1 }
  0x4f   : > { %p1206_p8 = scmp.ne.s32.totalorder %s1480_s5, %s1205_s11  ;;  %p1212_p1 = scmp.lt.s32.totalorder %s1210_s6, %s1205_s11 }
  0x51   : > { %p1208_p12 = pnand %p1206_p8, %p1179_p10  ;;  %p1213_p2 = por %p1212_p1, %p1211_p5 }
  0x53   : > { %p1209_p0 = pneg %p1208_p12 }
  0x55   : > { %p1214_p4 = pnand %p1213_p2, %p1209_p0 }
  0x57   : > { %1217 = shalt.err (!%p1214_p4)
}
  0x58   : > { %s1218_s10 = scalar_lea.vmem %s1474_s13, 18432  ;;  %s1314_s12 = smov [#allocation5]  }
  0x59   : > { %p1219_p6 = scmp.ne.s32.totalorder %s1474_s13, %s1218_s10  ;;  %s1223_s26 = sshll.u32 %s1314_s12, 4  ;;  %s1224_s26 = int_to_ptr.vmem [resolvable:$false] %s1223_s26 }
  0x5a   : > { %s1225_s30 = scalar_lea.vmem %s1224_s26, 36864  ;;  %p1226_p7 = scmp.lt.s32.totalorder %s1474_s13, %s1224_s26 }
  0x5b   : > { %p1221_p9 = pnand %p1219_p6, %p1179_p10  ;;  %p1227_p13 = scmp.lt.s32.totalorder %s1225_s30, %s1218_s10 }
  0x5d   : > { %p1222_p3 = pneg %p1221_p9  ;;  %p1228_p8 = por %p1227_p13, %p1226_p7 }
  0x5f   : > { %p1229_p12 = pnand %p1228_p8, %p1222_p3 }
  0x61   : > { %1232 = shalt.err (!%p1229_p12)
}
  0x62   : > { %s1315_s25 = smov 384   ;;  %s1316_s11 = smov 24  }
  0x63   : > { %1070 = dma.hbm_to_vmem [thread:$0]  (!%p1440_p11), %s1480_s5, 18432, %s1474_s13, %s1482_s7, %s1315_s25, %s1315_s25, %s1316_s11  }
  0x64   : > { %p1764_p10 = scmp.ne.s32.totalorder %s1759_s23, 0 }
  0x65   : > { %s1510_s24 = sand.u32 (!%p1764_p10), 1, %s1301_s16   ;;  %p1765_p0 = scmp.ne.s32.totalorder (!%p1764_p10), %s1757_s21, 0 }
  0x66   : > { %226 = sbr.rel (%p1764_p10) target bundleno = 478 (0x1de), region = 36  ;;  %s229_s6 = scalar_lea.sflag (!%p1764_p10), [#allocation3], %s1510_s24 }
  0x67   : > { %s1040_s28 = smul.u32 (!%p1764_p10), 24, %s1510_s24 }
  0x69   : > { %s1516_s8 = scalar_lea.vmem (!%p1764_p10), [#allocation2], %s1040_s28 }
  0x6b   : > { %1276 = dma.done.wait (%p1765_p0), %s229_s6, 384  }
  0x6c   : > { %1278 = vsyncadd (%p1765_p0), %s229_s6, 4294966912  ;;  %s237_s23 = sand.u32 1, %s1366_s19   ;;  %s1041_s27 = smul.u32 1152, %s1510_s24 }
  0x6d   : > { %s238_s13 = scalar_lea.sflag [#allocation6], %s237_s23 }
  0x6e   : > { %s1524_s5 = scalar_lea.vmem [#allocation5], %s1041_s27 }
  0x6f   : > { %1280 = dma.done.wait (%p1765_p0), %s238_s13, 18432  }
  0x70   : > { %1282 = vsyncadd (%p1765_p0), %s238_s13, 4294948864  ;;  %p1766_p11 = scmp.eq.s32.totalorder %s1366_s19, 0 }
  0x72   : > { %1284 = dma.done.wait (%p1766_p11), [#allocation6], 48   ;;  %p1767_p5 = pmov %p1766_p11 }
  0x74   : > { %1286 = vsyncadd (%p1767_p5), [#allocation6], 4294967248  ;;  %p1768_p1 = pmov %p1767_p5 }
  0x76   : > { %1288 = dma.done.wait (%p1768_p1), [#allocation9], 48   ;;  %p1769_p2 = pmov %p1768_p1 }
  0x77   : > { %v1317_v0 = vmov 0.0   ;;  %v328_v1 = vld [vmem:[%s1524_s5 + $0x170] sm:$0xff]  ;;  %v327_v2 = vld [vmem:[%s1524_s5 + $0x168] sm:$0xff]  ;;  %v325_v3 = vld [vmem:[%s1524_s5 + $0x158] sm:$0xff]  ;;  %vm1318_vm0 = vmmov 0   ;;  %s278_s21 = scalar_lea.vmem [#allocation10], %s1040_s28 }
  0x78   : > { %1290 = vsyncadd (%p1769_p2), [#allocation9], 4294967248  ;;  %561 = vmatprep.mubr.f32.mxu1 %v1317_v0  ;;  %426 = vmatprep.subr.mxu0 %v328_v1  ;;  %v324_v4 = vld [vmem:[%s1524_s5 + $0x150] sm:$0xff]  ;;  %v322_v5 = vld [vmem:[%s1524_s5 + $0x140] sm:$0xff]  ;;  %s1042_s7 = smul.u32 384, %s1366_s19  ;;  %s824_s9 = sshll.u32 %s278_s21, 4  ;;  %s825_s9 = int_to_ptr.vmem [resolvable:$true] %s824_s9 }
  0x79   : > { %427 = vmatpush1.msra.mxu0 %v327_v2  ;;  %v321_v6 = vld [vmem:[%s1524_s5 + $0x138] sm:$0xff]  ;;  %v319_v7 = vld [vmem:[%s1524_s5 + $0x128] sm:$0xff]  ;;  %v318_v8 = vld [vmem:[%s1524_s5 + $0x120] sm:$0xff]  ;;  %s810_s30 = scalar_lea.sflag [#allocation4], %s1510_s24  ;;  %s1233_s25 = scalar_lea.vmem %s825_s9, 384 }
  0x7a   : > { %428 = vmatprep.subr.mxu0 %v325_v3  ;;  %v316_v9 = vld [vmem:[%s1524_s5 + $0x110] sm:$0xff]  ;;  %v315_v10 = vld [vmem:[%s1524_s5 + $0x108] sm:$0xff]  ;;  %v313_v11 = vld [vmem:[%s1524_s5 + $0xf8] sm:$0xff]  ;;  %s822_s26 = scalar_lea.hbm %s1752_s4, %s1042_s7  ;;  %p1234_p4 = scmp.ne.s32.totalorder %s825_s9, %s1233_s25 }
  0x7b   : > { %429 = vmatpush1.msra.mxu0 %v324_v4  ;;  %v312_v12 = vld [vmem:[%s1524_s5 + $0xf0] sm:$0xff]  ;;  %v423_v14 = vld [vmem:[%s1524_s5 + $0x468] sm:$0xff]  ;;  %v310_v15 = vld [vmem:[%s1524_s5 + $0xe0] sm:$0xff]  ;;  %p1770_p6 = scmp.ne.s32.totalorder %s1762_s20, 0  ;;  %s1319_s11 = smov [#allocation10]  }
  0x7c   : > { %430 = vmatprep.subr.mxu0 %v322_v5  ;;  %v424_v13 = vld [vmem:[%s1524_s5 + $0x470] sm:$0xff]  ;;  %v421_v16 = vld [vmem:[%s1524_s5 + $0x458] sm:$0xff]  ;;  %v418_v19 = vld [vmem:[%s1524_s5 + $0x440] sm:$0xff]  ;;  %s1237_s28 = sshll.u32 %s1319_s11, 4  ;;  %s1238_s28 = int_to_ptr.vmem [resolvable:$false] %s1237_s28 }
  0x7d   : > { %431 = vmatpush1.msra.mxu0 %v321_v6  ;;  %497 = vmatprep.subr.mxu1 %v424_v13  ;;  %v309_v17 = vld [vmem:[%s1524_s5 + $0xd8] sm:$0xff]  ;;  %v420_v18 = vld [vmem:[%s1524_s5 + $0x450] sm:$0xff]  ;;  %v307_v20 = vld [vmem:[%s1524_s5 + $0xc8] sm:$0xff]  ;;  %p1235_p9 = pnand %p1234_p4, %p1770_p6  ;;  %s1239_s6 = scalar_lea.vmem %s1238_s28, 768 }
  0x7e   : > { %432 = vmatprep.subr.mxu0 %v319_v7  ;;  %498 = vmatpush1.msra.mxu1 %v423_v14  ;;  %v417_v21 = vld [vmem:[%s1524_s5 + $0x438] sm:$0xff]  ;;  %v306_v22 = vld [vmem:[%s1524_s5 + $0xc0] sm:$0xff]  ;;  %v415_v23 = vld [vmem:[%s1524_s5 + $0x428] sm:$0xff]  ;;  %p1240_p7 = scmp.lt.s32.totalorder %s825_s9, %s1238_s28  ;;  %p1241_p13 = scmp.lt.s32.totalorder %s1239_s6, %s1233_s25 }
  0x7f   : > { %433 = vmatpush1.msra.mxu0 %v318_v8  ;;  %499 = vmatprep.subr.mxu1 %v421_v16  ;;  %v304_v24 = vld [vmem:[%s1524_s5 + $0xb0] sm:$0xff]  ;;  %v414_v25 = vld [vmem:[%s1524_s5 + $0x420] sm:$0xff]  ;;  %v303_v26 = vld [vmem:[%s1524_s5 + $0xa8] sm:$0xff]  ;;  %p1236_p3 = pneg %p1235_p9 }
  0x80   : > { %434 = vmatprep.subr.mxu0 %v316_v9  ;;  %500 = vmatpush1.msra.mxu1 %v420_v18  ;;  %v412_v27 = vld [vmem:[%s1524_s5 + $0x410] sm:$0xff]  ;;  %v301_v28 = vld [vmem:[%s1524_s5 + $0x98] sm:$0xff]  ;;  %v411_v29 = vld [vmem:[%s1524_s5 + $0x408] sm:$0xff]  ;;  %p1242_p8 = por %p1241_p13, %p1240_p7 }
  0x81   : > { %435 = vmatpush1.msra.mxu0 %v315_v10  ;;  %501 = vmatprep.subr.mxu1 %v418_v19  ;;  %v300_v30 = vld [vmem:[%s1524_s5 + $0x90] sm:$0xff]  ;;  %v409_v31 = vld [vmem:[%s1524_s5 + $0x3f8] sm:$0xff]  ;;  %v298_v32 = vld [vmem:[%s1524_s5 + $0x80] sm:$0xff] }
  0x82   : > { %436 = vmatprep.subr.mxu0 %v313_v11  ;;  %502 = vmatpush1.msra.mxu1 %v417_v21  ;;  %v408_v33 = vld [vmem:[%s1524_s5 + $0x3f0] sm:$0xff]  ;;  %v297_v34 = vld [vmem:[%s1524_s5 + $0x78] sm:$0xff]  ;;  %v406_v35 = vld [vmem:[%s1524_s5 + $0x3e0] sm:$0xff]  ;;  %p1243_p12 = pnand %p1242_p8, %p1236_p3 }
  0x83   : > { %437 = vmatpush1.msra.mxu0 %v312_v12  ;;  %503 = vmatprep.subr.mxu1 %v415_v23  ;;  %v295_v36 = vld [vmem:[%s1524_s5 + $0x68] sm:$0xff]  ;;  %v405_v37 = vld [vmem:[%s1524_s5 + $0x3d8] sm:$0xff]  ;;  %v294_v38 = vld [vmem:[%s1524_s5 + $0x60] sm:$0xff] }
  0x84   : > { %438 = vmatprep.subr.mxu0 %v310_v15  ;;  %504 = vmatpush1.msra.mxu1 %v414_v25  ;;  %v403_v39 = vld [vmem:[%s1524_s5 + $0x3c8] sm:$0xff]  ;;  %v292_v40 = vld [vmem:[%s1524_s5 + $0x50] sm:$0xff]  ;;  %v402_v41 = vld [vmem:[%s1524_s5 + $0x3c0] sm:$0xff] }
  0x85   : > { %439 = vmatpush1.msra.mxu0 %v309_v17  ;;  %505 = vmatprep.subr.mxu1 %v412_v27  ;;  %v291_v42 = vld [vmem:[%s1524_s5 + $0x48] sm:$0xff]  ;;  %v400_v43 = vld [vmem:[%s1524_s5 + $0x3b0] sm:$0xff]  ;;  %v289_v44 = vld [vmem:[%s1524_s5 + $0x38] sm:$0xff] }
  0x86   : > { %440 = vmatprep.subr.mxu0 %v307_v20  ;;  %506 = vmatpush1.msra.mxu1 %v411_v29  ;;  %v399_v45 = vld [vmem:[%s1524_s5 + $0x3a8] sm:$0xff]  ;;  %v288_v46 = vld [vmem:[%s1524_s5 + $0x30] sm:$0xff]  ;;  %v397_v47 = vld [vmem:[%s1524_s5 + $0x398] sm:$0xff] }
  0x87   : > { %441 = vmatpush1.msra.mxu0 %v306_v22  ;;  %507 = vmatprep.subr.mxu1 %v409_v31  ;;  %v286_v48 = vld [vmem:[%s1524_s5 + $0x20] sm:$0xff]  ;;  %v396_v49 = vld [vmem:[%s1524_s5 + $0x390] sm:$0xff]  ;;  %v285_v50 = vld [vmem:[%s1524_s5 + $0x18] sm:$0xff] }
  0x88   : > { %442 = vmatprep.subr.mxu0 %v304_v24  ;;  %508 = vmatpush1.msra.mxu1 %v408_v33  ;;  %v394_v51 = vld [vmem:[%s1524_s5 + $0x380] sm:$0xff]  ;;  %v283_v52 = vld [vmem:[%s1524_s5 + $0x8] sm:$0xff]  ;;  %v393_v53 = vld [vmem:[%s1524_s5 + $0x378] sm:$0xff] }
  0x89   : > { %443 = vmatpush1.msra.mxu0 %v303_v26  ;;  %509 = vmatprep.subr.mxu1 %v406_v35  ;;  %v282_v54 = vld [vmem:[%s1524_s5] sm:$0xff]  ;;  %v391_v55 = vld [vmem:[%s1524_s5 + $0x368] sm:$0xff]  ;;  %v376_v56 = vld [vmem:[%s1524_s5 + $0x2f0] sm:$0xff] }
  0x8a   : > { %444 = vmatprep.subr.mxu0 %v301_v28  ;;  %510 = vmatpush1.msra.mxu1 %v405_v37  ;;  %v390_v57 = vld [vmem:[%s1524_s5 + $0x360] sm:$0xff]  ;;  %v375_v58 = vld [vmem:[%s1524_s5 + $0x2e8] sm:$0xff]  ;;  %v388_v59 = vld [vmem:[%s1524_s5 + $0x350] sm:$0xff] }
  0x8b   : > { %445 = vmatpush1.msra.mxu0 %v300_v30  ;;  %511 = vmatprep.subr.mxu1 %v403_v39  ;;  %v373_v60 = vld [vmem:[%s1524_s5 + $0x2d8] sm:$0xff]  ;;  %v387_v61 = vld [vmem:[%s1524_s5 + $0x348] sm:$0xff]  ;;  %v372_v62 = vld [vmem:[%s1524_s5 + $0x2d0] sm:$0xff] }
  0x8c   : > { %446 = vmatprep.subr.mxu0 %v298_v32  ;;  %512 = vmatpush1.msra.mxu1 %v402_v41  ;;  %v385_v63 = vld [vmem:[%s1524_s5 + $0x338] sm:$0xff]  ;;  %v370_v1 = vld [vmem:[%s1524_s5 + $0x2c0] sm:$0xff]  ;;  %v384_v2 = vld [vmem:[%s1524_s5 + $0x330] sm:$0xff] }
  0x8d   : > { %447 = vmatpush1.msra.mxu0 %v297_v34  ;;  %513 = vmatprep.subr.mxu1 %v400_v43  ;;  %v369_v3 = vld [vmem:[%s1524_s5 + $0x2b8] sm:$0xff]  ;;  %v382_v4 = vld [vmem:[%s1524_s5 + $0x320] sm:$0xff]  ;;  %v367_v5 = vld [vmem:[%s1524_s5 + $0x2a8] sm:$0xff] }
  0x8e   : > { %448 = vmatprep.subr.mxu0 %v295_v36  ;;  %514 = vmatpush1.msra.mxu1 %v399_v45  ;;  %v381_v6 = vld [vmem:[%s1524_s5 + $0x318] sm:$0xff]  ;;  %v366_v7 = vld [vmem:[%s1524_s5 + $0x2a0] sm:$0xff]  ;;  %v379_v8 = vld [vmem:[%s1524_s5 + $0x308] sm:$0xff] }
  0x8f   : > { %449 = vmatpush1.msra.mxu0 %v294_v38  ;;  %515 = vmatprep.subr.mxu1 %v397_v47  ;;  %v364_v9 = vld [vmem:[%s1524_s5 + $0x290] sm:$0xff]  ;;  %v378_v10 = vld [vmem:[%s1524_s5 + $0x300] sm:$0xff]  ;;  %v363_v11 = vld [vmem:[%s1524_s5 + $0x288] sm:$0xff] }
  0x90   : > { %450 = vmatprep.subr.mxu0 %v292_v40  ;;  %516 = vmatpush1.msra.mxu1 %v396_v49  ;;  %v377_v12 = vld [vmem:[%s1524_s5 + $0x2f8] sm:$0xff]  ;;  %v360_v15 = vld [vmem:[%s1524_s5 + $0x270] sm:$0xff]  ;;  %v358_v17 = vld [vmem:[%s1524_s5 + $0x260] sm:$0xff] }
  0x91   : > { %451 = vmatpush1.msra.mxu0 %v291_v42  ;;  %517 = vmatprep.subr.mxu1 %v394_v51  ;;  %v361_v13 = vld [vmem:[%s1524_s5 + $0x278] sm:$0xff]  ;;  %v374_v18 = vld [vmem:[%s1524_s5 + $0x2e0] sm:$0xff]  ;;  %v355_v21 = vld [vmem:[%s1524_s5 + $0x248] sm:$0xff] }
  0x92   : > { %452 = vmatprep.subr.mxu0 %v289_v44  ;;  %518 = vmatpush1.msra.mxu1 %v393_v53  ;;  %v1616_v14 = vld [vmem:[%s1516_s8 + $0x10] sm:$0xff]  ;;  %v371_v22 = vld [vmem:[%s1524_s5 + $0x2c8] sm:$0xff]  ;;  %v1629_v24 = vld [vmem:[%s1516_s8 + $0x8] sm:$0xff] }
  0x93   : > { %453 = vmatpush1.msra.mxu0 %v288_v46  ;;  %519 = vmatprep.subr.mxu1 %v391_v55  ;;  %v329_v16 = vld [vmem:[%s1524_s5 + $0x178] sm:$0xff]  ;;  %v326_v20 = vld [vmem:[%s1524_s5 + $0x160] sm:$0xff]  ;;  %v352_v25 = vld [vmem:[%s1524_s5 + $0x230] sm:$0xff] }
  0x94   : > { %454 = vmatprep.subr.mxu0 %v286_v48  ;;  %520 = vmatpush1.msra.mxu1 %v390_v57  ;;  %v357_v19 = vld [vmem:[%s1524_s5 + $0x258] sm:$0xff]  ;;  %v354_v23 = vld [vmem:[%s1524_s5 + $0x240] sm:$0xff]  ;;  %v323_v26 = vld [vmem:[%s1524_s5 + $0x148] sm:$0xff] }
  0x95   : > { %455 = vmatpush1.msra.mxu0 %v285_v50  ;;  %521 = vmatprep.subr.mxu1 %v388_v59  ;;  %v351_v27 = vld [vmem:[%s1524_s5 + $0x228] sm:$0xff]  ;;  %v368_v28 = vld [vmem:[%s1524_s5 + $0x2b0] sm:$0xff]  ;;  %v349_v29 = vld [vmem:[%s1524_s5 + $0x218] sm:$0xff] }
  0x96   : > { %456 = vmatprep.subr.mxu0 %v283_v52  ;;  %522 = vmatpush1.msra.mxu1 %v387_v61  ;;  %v320_v30 = vld [vmem:[%s1524_s5 + $0x130] sm:$0xff]  ;;  %v365_v32 = vld [vmem:[%s1524_s5 + $0x298] sm:$0xff]  ;;  %v346_v33 = vld [vmem:[%s1524_s5 + $0x200] sm:$0xff] }
  0x97   : > { %457 = vmatpush1.msra.mxu0 %v282_v54  ;;  %523 = vmatprep.subr.mxu1 %v385_v63  ;;  %v348_v31 = vld [vmem:[%s1524_s5 + $0x210] sm:$0xff]  ;;  %v317_v34 = vld [vmem:[%s1524_s5 + $0x118] sm:$0xff]  ;;  %v362_v36 = vld [vmem:[%s1524_s5 + $0x280] sm:$0xff] }
  0x98   : > { %458 = vmatprep.subr.mxu0 %v376_v56  ;;  %524 = vmatpush1.msra.mxu1 %v384_v2  ;;  %v345_v35 = vld [vmem:[%s1524_s5 + $0x1f8] sm:$0xff]  ;;  %v343_v37 = vld [vmem:[%s1524_s5 + $0x1e8] sm:$0xff]  ;;  %v314_v38 = vld [vmem:[%s1524_s5 + $0x100] sm:$0xff] }
  0x99   : > { %459 = vmatpush2.msra.mxu0 %v375_v58  ;;  %525 = vmatprep.subr.mxu1 %v382_v4  ;;  %v342_v39 = vld [vmem:[%s1524_s5 + $0x1e0] sm:$0xff]  ;;  %v359_v40 = vld [vmem:[%s1524_s5 + $0x268] sm:$0xff]  ;;  %v340_v41 = vld [vmem:[%s1524_s5 + $0x1d0] sm:$0xff] }
  0x9a   : > { %460 = vmatprep.subr.mxu0 %v373_v60  ;;  %526 = vmatpush1.msra.mxu1 %v381_v6  ;;  %v311_v42 = vld [vmem:[%s1524_s5 + $0xe8] sm:$0xff]  ;;  %v356_v44 = vld [vmem:[%s1524_s5 + $0x250] sm:$0xff]  ;;  %v337_v45 = vld [vmem:[%s1524_s5 + $0x1b8] sm:$0xff] }
  0x9b   : > { %461 = vmatpush2.msra.mxu0 %v372_v62  ;;  %527 = vmatprep.subr.mxu1 %v379_v8  ;;  %v339_v43 = vld [vmem:[%s1524_s5 + $0x1c8] sm:$0xff]  ;;  %v308_v46 = vld [vmem:[%s1524_s5 + $0xd0] sm:$0xff]  ;;  %v353_v48 = vld [vmem:[%s1524_s5 + $0x238] sm:$0xff] }
  0x9c   : > { %462 = vmatprep.subr.mxu0 %v370_v1  ;;  %528 = vmatpush1.msra.mxu1 %v378_v10  ;;  %v336_v47 = vld [vmem:[%s1524_s5 + $0x1b0] sm:$0xff]  ;;  %v334_v49 = vld [vmem:[%s1524_s5 + $0x1a0] sm:$0xff]  ;;  %v305_v50 = vld [vmem:[%s1524_s5 + $0xb8] sm:$0xff] }
  0x9d   : > { %463 = vmatpush2.msra.mxu0 %v369_v3  ;;  %949 = vmatprep.subr.mxu1 %v377_v12  ;;  %v333_v51 = vld [vmem:[%s1524_s5 + $0x198] sm:$0xff]  ;;  %v350_v52 = vld [vmem:[%s1524_s5 + $0x220] sm:$0xff]  ;;  %v331_v53 = vld [vmem:[%s1524_s5 + $0x188] sm:$0xff] }
  0x9e   : > { %464 = vmatprep.subr.mxu0 %v367_v5  ;;  %562 = vmatmul.mubr.f32.vlgmr.msra.gmra.mxu1 %v1616_v14  ;;  %v302_v54 = vld [vmem:[%s1524_s5 + $0xa0] sm:$0xff]  ;;  %v347_v56 = vld [vmem:[%s1524_s5 + $0x208] sm:$0xff]  ;;  %v425_v58 = vld [vmem:[%s1524_s5 + $0x478] sm:$0xff] }
  0x9f   : > { %465 = vmatpush2.msra.mxu0 %v366_v7  ;;  %950 = vmatpush3.msra.mxu1 %v329_v16  ;;  %v330_v55 = vld [vmem:[%s1524_s5 + $0x180] sm:$0xff]  ;;  %v279_v57 = vld [vmem:[%s1516_s8] sm:$0xff]  ;;  %v341_v63 = vld [vmem:[%s1524_s5 + $0x1d8] sm:$0xff] }
  0xa0   : > { %466 = vmatprep.subr.mxu0 %v364_v9  ;;  %951 = vmatprep.subr.mxu1 %v374_v18  ;;  %v299_v59 = vld [vmem:[%s1524_s5 + $0x88] sm:$0xff]  ;;  %v344_v60 = vld [vmem:[%s1524_s5 + $0x1f0] sm:$0xff]  ;;  %v422_v61 = vld [vmem:[%s1524_s5 + $0x460] sm:$0xff] }
  0xa1   : > { %467 = vmatpush2.msra.mxu0 %v363_v11  ;;  %952 = vmatpush3.msra.mxu1 %v326_v20  ;;  %v296_v62 = vld [vmem:[%s1524_s5 + $0x70] sm:$0xff]  ;;  %v419_v1 = vld [vmem:[%s1524_s5 + $0x448] sm:$0xff]  ;;  %v293_v2 = vld [vmem:[%s1524_s5 + $0x58] sm:$0xff] }
  0xa2   : > { %468 = vmatprep.subr.mxu0 %v361_v13  ;;  %953 = vmatprep.subr.mxu1 %v371_v22  ;;  %v338_v3 = vld [vmem:[%s1524_s5 + $0x1c0] sm:$0xff]  ;;  %v416_v4 = vld [vmem:[%s1524_s5 + $0x430] sm:$0xff]  ;;  %v335_v6 = vld [vmem:[%s1524_s5 + $0x1a8] sm:$0xff] }
  0xa3   : > { %469 = vmatpush2.msra.mxu0 %v360_v15  ;;  %490 = vmatprep.mubr.f32.mxu0 %v1629_v24  ;;  %v290_v5 = vld [vmem:[%s1524_s5 + $0x40] sm:$0xff]  ;;  %v413_v7 = vld [vmem:[%s1524_s5 + $0x418] sm:$0xff]  ;;  %v287_v8 = vld [vmem:[%s1524_s5 + $0x28] sm:$0xff] }
  0xa4   : > { %470 = vmatprep.subr.mxu0 %v358_v17  ;;  %954 = vmatpush3.msra.mxu1 %v323_v26  ;;  %v332_v9 = vld [vmem:[%s1524_s5 + $0x190] sm:$0xff]  ;;  %v410_v10 = vld [vmem:[%s1524_s5 + $0x400] sm:$0xff]  ;;  %v407_v12 = vld [vmem:[%s1524_s5 + $0x3e8] sm:$0xff] }
  0xa5   : > { %471 = vmatpush2.msra.mxu0 %v357_v19  ;;  %955 = vmatprep.subr.mxu1 %v368_v28  ;;  %v284_v11 = vld [vmem:[%s1524_s5 + $0x10] sm:$0xff]  ;;  %v401_v15 = vld [vmem:[%s1524_s5 + $0x3b8] sm:$0xff]  ;;  %v398_v16 = vld [vmem:[%s1524_s5 + $0x3a0] sm:$0xff] }
  0xa6   : > { %472 = vmatprep.subr.mxu0 %v355_v21  ;;  %956 = vmatpush3.msra.mxu1 %v320_v30  ;;  %v404_v13 = vld [vmem:[%s1524_s5 + $0x3d0] sm:$0xff]  ;;  %v395_v17 = vld [vmem:[%s1524_s5 + $0x388] sm:$0xff]  ;;  %v389_v19 = vld [vmem:[%s1524_s5 + $0x358] sm:$0xff] }
  0xa7   : > { %473 = vmatpush2.msra.mxu0 %v354_v23  ;;  %957 = vmatprep.subr.mxu1 %v365_v32  ;;  %v392_v18 = vld [vmem:[%s1524_s5 + $0x370] sm:$0xff]  ;;  %v386_v20 = vld [vmem:[%s1524_s5 + $0x340] sm:$0xff]  ;;  %v383_v21 = vld [vmem:[%s1524_s5 + $0x328] sm:$0xff] }
  0xa8   : > { %474 = vmatprep.subr.mxu0 %v352_v25  ;;  %958 = vmatpush3.msra.mxu1 %v317_v34  ;;  %v380_v22 = vld [vmem:[%s1524_s5 + $0x310] sm:$0xff] }
  0xa9   : > { %475 = vmatpush2.msra.mxu0 %v351_v27  ;;  %959 = vmatprep.subr.mxu1 %v362_v36 }
  0xaa   : > { %476 = vmatprep.subr.mxu0 %v349_v29  ;;  %960 = vmatpush3.msra.mxu1 %v314_v38 }
  0xab   : > { %477 = vmatpush2.msra.mxu0 %v348_v31  ;;  %961 = vmatprep.subr.mxu1 %v359_v40 }
  0xac   : > { %478 = vmatprep.subr.mxu0 %v346_v33  ;;  %962 = vmatpush3.msra.mxu1 %v311_v42 }
  0xad   : > { %479 = vmatpush2.msra.mxu0 %v345_v35  ;;  %963 = vmatprep.subr.mxu1 %v356_v44 }
  0xae   : > { %480 = vmatprep.subr.mxu0 %v343_v37  ;;  %964 = vmatpush3.msra.mxu1 %v308_v46 }
  0xaf   : > { %481 = vmatpush2.msra.mxu0 %v342_v39  ;;  %965 = vmatprep.subr.mxu1 %v353_v48 }
  0xb0   : > { %482 = vmatprep.subr.mxu0 %v340_v41  ;;  %966 = vmatpush3.msra.mxu1 %v305_v50 }
  0xb1   : > { %483 = vmatpush2.msra.mxu0 %v339_v43  ;;  %967 = vmatprep.subr.mxu1 %v350_v52 }
  0xb2   : > { %484 = vmatprep.subr.mxu0 %v337_v45  ;;  %968 = vmatpush3.msra.mxu1 %v302_v54 }
  0xb3   : > { %485 = vmatpush2.msra.mxu0 %v336_v47  ;;  %969 = vmatprep.subr.mxu1 %v347_v56 }
  0xb4   : > { %486 = vmatprep.subr.mxu0 %v334_v49  ;;  %970 = vmatpush3.msra.mxu1 %v299_v59 }
  0xb5   : > { %487 = vmatpush2.msra.mxu0 %v333_v51  ;;  %971 = vmatprep.subr.mxu1 %v344_v60 }
  0xb6   : > { %488 = vmatprep.subr.mxu0 %v331_v53  ;;  %972 = vmatpush3.msra.mxu1 %v296_v62 }
  0xb7   : > { %489 = vmatpush2.msra.mxu0 %v330_v55  ;;  %973 = vmatprep.subr.mxu1 %v341_v63 }
  0xb8   : > { %491 = vmatmul.mubr.f32.vlgmr.msra.gmra.mxu0 %v279_v57  ;;  %1001 = vmatprep.subr.mxu0 %v1317_v0 }
  0xb9   : > { %1002 = vmatpush3.msra.mxu0 %v425_v58  ;;  %974 = vmatpush3.msra.mxu1 %v293_v2 }
  0xba   : > { %1003 = vmatprep.subr.mxu0 %v1317_v0  ;;  %975 = vmatprep.subr.mxu1 %v338_v3 }
  0xbb   : > { %1004 = vmatpush3.msra.mxu0 %v422_v61  ;;  %976 = vmatpush3.msra.mxu1 %v290_v5 }
  0xbc   : > { %1005 = vmatprep.subr.mxu0 %v1317_v0  ;;  %977 = vmatprep.subr.mxu1 %v335_v6 }
  0xbd   : > { %1006 = vmatpush3.msra.mxu0 %v419_v1  ;;  %978 = vmatpush3.msra.mxu1 %v287_v8 }
  0xbe   : > { %1007 = vmatprep.subr.mxu0 %v1317_v0  ;;  %979 = vmatprep.subr.mxu1 %v332_v9 }
  0xbf   : > { %1008 = vmatpush3.msra.mxu0 %v416_v4  ;;  %980 = vmatpush3.msra.mxu1 %v284_v11  ;;  %v768_v4 = vlaneseq }
  0xc0   : > { %1009 = vmatprep.subr.mxu0 %v1317_v0  ;;  %632 = vmatprep.mubr.f32.mxu1 %v1629_v24 }
  0xc1   : > { %1010 = vmatpush3.msra.mxu0 %v413_v7  ;;  %633 = vmatmul.mubr.f32.vlgmr.msra.gmra.mxu1 %v279_v57  ;;  %v769_v8 = vshrl.u32 %v768_v4, 7 }
  0xc2   : > { %1011 = vmatprep.subr.mxu0 %v1317_v0  ;;  %1033 = vmatprep.mubr.msk.f32.mxu0 %vm1318_vm0, %v1317_v0 }
  0xc3   : > { %1012 = vmatpush3.msra.mxu0 %v410_v10  ;;  %v770_v11 = vsub.s32 0, %v769_v8 }
  0xc4   : > { %1013 = vmatprep.subr.mxu0 %v1317_v0 }
  0xc5   : > { %1014 = vmatpush3.msra.mxu0 %v407_v12 }
  0xc6   : > { %1015 = vmatprep.subr.mxu0 %v1317_v0 }
  0xc7   : > { %1016 = vmatpush3.msra.mxu0 %v404_v13  ;;  %v766_v13 = vld [vmem:[#allocation7] sm:$0x7] }
  0xc8   : > { %1017 = vmatprep.subr.mxu0 %v1317_v0 }
  0xc9   : > { %1018 = vmatpush3.msra.mxu0 %v401_v15  ;;  %v774_v15 = vsub.s32 1, %v769_v8 }
  0xca   : > { %1019 = vmatprep.subr.mxu0 %v1317_v0 }
  0xcb   : > { %1020 = vmatpush3.msra.mxu0 %v398_v16 }
  0xcc   : > { %1021 = vmatprep.subr.mxu0 %v1317_v0 }
  0xcd   : > { %1022 = vmatpush3.msra.mxu0 %v395_v17  ;;  %v786_v17 = vld [vmem:[#allocation8] sm:$0x7] }
  0xce   : > { %1023 = vmatprep.subr.mxu0 %v1317_v0 }
  0xcf   : > { %1024 = vmatpush3.msra.mxu0 %v392_v18  ;;  %v771_v18 = vrot.slane %v766_v13, %v770_v11 }
  0xd0   : > { %1025 = vmatprep.subr.mxu0 %v1317_v0 }
  0xd1   : > { %1026 = vmatpush3.msra.mxu0 %v389_v19 }
  0xd2   : > { %1027 = vmatprep.subr.mxu0 %v1317_v0 }
  0xd3   : > { %1028 = vmatpush3.msra.mxu0 %v386_v20 }
  0xd4   : > { %1029 = vmatprep.subr.mxu0 %v1317_v0 }
  0xd5   : > { %1030 = vmatpush3.msra.mxu0 %v383_v21 }
  0xd6   : > { %1031 = vmatprep.subr.mxu0 %v1317_v0 }
  0xd7   : > { %1032 = vmatpush3.msra.mxu0 %v380_v22  ;;  %v791_v22 = vrot.slane %v786_v17, %v770_v11 }
  0xd8   : > { %1034 = vmatmul.mubr.f32.vlgmr.msra.gmra.mxu0 %v1616_v14 }
 0x15e   : > { %v563_v23 = vpop.f32.mrf.mxu1 }
 0x160   : > { %v565_v26 = vpop.f32.mrf.mxu1 }
 0x178   : > { %v492_v24 = vpop.f32.mrf.mxu0 }
 0x179   : > { %v564_v25 = vadd.f32 %v563_v23, %v492_v24  ;;  %v775_v23 = vrot.slane %v766_v13, %v774_v15 }
 0x17a   : > { %v494_v27 = vpop.f32.mrf.mxu0 }
 0x17b   : > { %v708_v28 = vrot.slane %v564_v25, 4  ;;  %v566_v29 = vadd.f32 %v565_v26, %v494_v27 }
 0x17d   : > { %v709_v30 = vadd.f32 %v708_v28, %v564_v25  ;;  %v714_v31 = vrot.slane %v566_v29, 4  ;;  %v795_v28 = vrot.slane %v786_v17, %v774_v15 }
 0x17f   : > { %v710_v32 = vrot.slane %v709_v30, 2  ;;  %v715_v33 = vadd.f32 %v714_v31, %v566_v29 }
 0x181   : > { %v711_v34 = vadd.f32 %v710_v32, %v709_v30  ;;  %v716_v35 = vrot.slane %v715_v33, 2  ;;  %v981_v48 = vpop.f32.mrf.mxu1 }
 0x183   : > { %v712_v36 = vrot.slane %v711_v34, 1  ;;  %v717_v37 = vadd.f32 %v716_v35, %v715_v33  ;;  %v982_v53 = vpop.f32.mrf.mxu1 }
 0x184   : > { %v983_v58 = vadd.f32 %v982_v53, %v981_v48 }
 0x185   : > { %v713_v38 = vadd.f32 %v712_v36, %v711_v34  ;;  %v718_v0 = vrot.slane %v717_v37, 1 }
 0x187   : > { %v727_v39 = vmul.f32 0.125, %v713_v38  ;;  %v719_v40 = vadd.f32 %v718_v0, %v717_v37 }
 0x189   : > { %v730_v14 = vsub.f32 %v564_v25, %v727_v39  ;;  %v728_v41 = vmul.f32 0.125, %v719_v40  ;;  %v778_v39 = vsub.s32 2, %v769_v8 }
 0x18b   : > { %v733_v42 = vmul.f32 %v730_v14, %v730_v14  ;;  %v731_v43 = vsub.f32 %v566_v29, %v728_v41  ;;  %v779_v40 = vrot.slane %v766_v13, %v778_v39 }
 0x18d   : > { %v736_v44 = vrot.slane %v733_v42, 4  ;;  %v734_v45 = vmul.f32 %v731_v43, %v731_v43 }
 0x18f   : > { %v737_v46 = vadd.f32 %v736_v44, %v733_v42  ;;  %v742_v47 = vrot.slane %v734_v45, 4  ;;  %v799_v42 = vrot.slane %v786_v17, %v778_v39 }
 0x191   : > { %v738_v49 = vrot.slane %v737_v46, 2  ;;  %v743_v50 = vadd.f32 %v742_v47, %v734_v45 }
 0x193   : > { %v739_v51 = vadd.f32 %v738_v49, %v737_v46  ;;  %v744_v52 = vrot.slane %v743_v50, 2 }
 0x195   : > { %v740_v54 = vrot.slane %v739_v51, 1  ;;  %v745_v55 = vadd.f32 %v744_v52, %v743_v50 }
 0x197   : > { %v741_v56 = vadd.f32 %v740_v54, %v739_v51  ;;  %v746_v57 = vrot.slane %v745_v55, 1 }
 0x198   : > { %v704_v59 = vpop.f32.mrf.mxu0 }
 0x199   : > { %v754_v60 = vmul.f32 0.125, %v741_v56  ;;  %v747_v61 = vadd.f32 %v746_v57, %v745_v55  ;;  %v705_v62 = vadd.f32 %v983_v58, %v704_v59 }
 0x19a   : > { %v1035_v63 = vpop.f32.mrf.mxu0 }
 0x19b   : > { %v757_v1 = vadd.f32 1e-05, %v754_v60  ;;  %v755_v2 = vmul.f32 0.125, %v747_v61  ;;  %v720_v3 = vrot.slane %v705_v62, 4 }
 0x19d   : > { %1119 = vrsqrt.f32 %v757_v1  ;;  %v758_v5 = vadd.f32 1e-05, %v755_v2  ;;  %v721_v6 = vadd.f32 %v720_v3, %v705_v62 }
 0x19f   : > { %1121 = vrsqrt.f32 %v758_v5  ;;  %v722_v7 = vrot.slane %v721_v6, 2 }
 0x1a1   : > { %v723_v9 = vadd.f32 %v722_v7, %v721_v6 }
 0x1a3   : > { %v724_v10 = vrot.slane %v723_v9, 1 }
 0x1a5   : > { %v725_v12 = vadd.f32 %v724_v10, %v723_v9 }
 0x1a7   : > { %v729_v16 = vmul.f32 0.125, %v725_v12 }
 0x1a9   : > { %v732_v19 = vsub.f32 %v705_v62, %v729_v16 }
 0x1aa   : > { %v1120_v20 = vpop.eup %1119 }
 0x1ab   : > { %v763_v21 = vmul.f32 %v1120_v20, %v730_v14  ;;  %v735_v24 = vmul.f32 %v732_v19, %v732_v19 }
 0x1ac   : > { %v1122_v25 = vpop.eup %1121 }
 0x1ad   : > { %v783_v26 = vmul.f32 %v771_v18, %v763_v21  ;;  %v764_v27 = vmul.f32 %v1122_v25, %v731_v43  ;;  %v748_v29 = vrot.slane %v735_v24, 4 }
 0x1af   : > { %v803_v30 = vadd.f32 %v791_v22, %v783_v26  ;;  %v784_v31 = vmul.f32 %v775_v23, %v764_v27  ;;  %v749_v32 = vadd.f32 %v748_v29, %v735_v24 }
 0x1b1   : > { %v804_v33 = vadd.f32 %v795_v28, %v784_v31  ;;  %v750_v34 = vrot.slane %v749_v32, 2  ;;  %806 = vst [vmem:[%s278_s21] sm:$0xff] %v803_v30 }
 0x1b3   : > { %v751_v35 = vadd.f32 %v750_v34, %v749_v32  ;;  %807 = vst [vmem:[%s278_s21 + $0x8] sm:$0xff] %v804_v33 }
 0x1b5   : > { %v752_v36 = vrot.slane %v751_v35, 1 }
 0x1b7   : > { %v753_v37 = vadd.f32 %v752_v36, %v751_v35 }
 0x1b9   : > { %v756_v38 = vmul.f32 0.125, %v753_v37 }
 0x1bb   : > { %v759_v0 = vadd.f32 1e-05, %v756_v38 }
 0x1bd   : > { %1123 = vrsqrt.f32 %v759_v0 }
 0x1ca   : > { %v1124_v14 = vpop.eup %1123 }
 0x1cb   : > { %v765_v41 = vmul.f32 %v1124_v14, %v732_v19 }
 0x1cd   : > { %v785_v43 = vmul.f32 %v779_v40, %v765_v41 }
 0x1cf   : > { %v805_v44 = vadd.f32 %v799_v42, %v785_v43 }
 0x1d1   : > { %808 = vst [vmem:[%s278_s21 + $0x10] sm:$0xff] %v805_v44 }
 0x1d2   : > { %1246 = shalt.err (!%p1243_p12)
}
 0x1d3   : > { %s1247_s19 = scalar_lea.hbm %s822_s26, 384  ;;  %s1251_s23 = scalar_lea.hbm %s1752_s4, 768 }
 0x1d4   : > { %p1248_p10 = scmp.ne.s32.totalorder %s822_s26, %s1247_s19  ;;  %p1252_p5 = scmp.lt.s32.totalorder %s822_s26, %s1752_s4 }
 0x1d5   : > { %p1253_p1 = scmp.lt.s32.totalorder %s1251_s23, %s1247_s19 }
 0x1d6   : > { %p1249_p0 = pnand %p1248_p10, %p1770_p6 }
 0x1d7   : > { %p1254_p2 = por %p1253_p1, %p1252_p5 }
 0x1d8   : > { %p1250_p11 = pneg %p1249_p0 }
 0x1da   : > { %p1255_p4 = pnand %p1254_p2, %p1250_p11 }
 0x1dc   : > { %1258 = shalt.err (!%p1255_p4)
}
 0x1dd   : > { %1055 = dma.vmem_to_hbm [thread:$0]  (%p1770_p6), %s825_s9, 384, %s822_s26, %s810_s30  }
 0x1de PF: > { %s836_s5 = sand.u32 1, %s1297_s15   ;;  %p1771_p9 = scmp.ne.s32.totalorder %s1758_s22, 0 }
 0x1df   : > { %p1772_p3 = scmp.ge.s32.totalorder %s1309_s18, 2  ;;  %s837_s21 = scalar_lea.sflag [#allocation4], %s836_s5 }
 0x1e1   : > { %p1072_p7 = pnand %p1772_p3, %p1771_p9 }
 0x1e3   : > { %p1073_p13 = pneg %p1072_p7 }
 0x1e5   : > { %1292 = dma.done.wait (%p1073_p13), %s837_s21, 384  }
 0x1e6   : > { %1294 = vsyncadd (%p1073_p13), %s837_s21, 4294966912  ;;  %p21_p8 = scmp.ge.s32.totalorder %s1399_s29, 4   ;;  %s1773_s15 = smov %s1301_s16 }
 0x1e7   : > { %s1774_s16 = smov %s1305_s17  ;;  %s1775_s17 = smov %s1426_s14 }
 0x1e8   : > { %s1776_s18 = smov %s1399_s29  ;;  %23 = sbr.rel (!%p21_p8) target bundleno = 8 (0x8), region = 102 }
 0x1ed   :  { %842 = vsyncpa [#allocation3], 1 }
 0x1ee   :  { %844 = vsyncpa [#allocation3 + $0x1], 1 }
 0x1ef   :  { %845 = vsyncpa [#allocation6], 1 }
 0x1f0   :  { %847 = vsyncpa [#allocation6 + $0x1], 1 }
 0x1f1   :  { %848 = vsyncpa [#allocation9], 1 }
 0x1f2   :  { %849 = vsyncpa [#allocation4], 1 }
 0x1f3   :  { %851 = vsyncpa [#allocation4 + $0x1], 1 }

</bundles_post_ra>
